<compile_context>
chip_gen: v7x
topology: tpu7x:2x2x1
jax: 0.10.0
libtpu: 0.0.40
codegen_flags: <defaults>
</compile_context>

<pallas_src>
import functools

import jax
import jax.numpy as jnp
from jax.experimental import pallas as pl
from jax.experimental.pallas import tpu as pltpu

KH = KW = 28      # Conv2d(1, 10, 28)
C_IN = 1
C_OUT = 10


def baseline_kernel(x_ref, w_ref, b_ref, o_ref, *, num_positions):
    # x_ref: (TB, H*W) f32     w_ref: (H*W, P*Co) f32  (columns are p-major, channel-minor)
    # b_ref: (1, Co)   f32     o_ref: (TB, Co)    f32
    s = jnp.dot(x_ref[...], w_ref[...],
                preferred_element_type=jnp.float32)          # one MXU push: (TB, P*Co)
    # Max over all spatial output positions FIRST (static lane slices, p-major layout).
    m = s[:, 0:C_OUT]
    for p in range(1, num_positions):
        m = jnp.maximum(m, s[:, p * C_OUT:(p + 1) * C_OUT])
    # Bias + tanh only on the reduced (TB, Co) tile; single unmasked-as-possible store.
    o_ref[...] = jnp.tanh(m + b_ref[...])


def expand_weight(weight, H, W):
    """(Co, 1, KH, KW) torch-layout weight -> (H*W, P*Co) expanded/shifted weight.

    Column index = p*Co + c with p = oi*Wo + oj, so
    dot(x_flat, W_exp)[b, p*Co + c] == conv(x, w)[b, c, oi, oj] (VALID conv, stride 1).
    """
    Ho, Wo = H - KH + 1, W - KW + 1
    w_hwc = jnp.transpose(weight.reshape(C_OUT, KH, KW), (1, 2, 0))  # (KH, KW, Co)
    cols = []
    for oi in range(Ho):
        for oj in range(Wo):
            padded = jnp.pad(w_hwc, ((oi, H - KH - oi), (oj, W - KW - oj), (0, 0)))
            cols.append(padded.reshape(H * W, C_OUT))
    return jnp.concatenate(cols, axis=1)                     # (H*W, Ho*Wo*Co)


def baseline_forward(x, weight, bias, *, batch_tile=128):
    """Equivalent of Baseline.forward: conv(1->10, k=28) -> tanh -> max W' -> max H'."""
    x = x.astype(jnp.float32)
    B, C, H, W = x.shape
    assert C == C_IN
    Ho, Wo = H - KH + 1, W - KW + 1
    P = Ho * Wo

    x_flat = x.reshape(B, H * W)                              # no data amplification
    w_exp = expand_weight(weight.astype(jnp.float32), H, W)   # (H*W, P*Co), batch-independent
    b2 = bias.reshape(1, C_OUT).astype(jnp.float32)

    TB = B if B <= batch_tile else batch_tile
    grid = (pl.cdiv(B, TB),)
    kernel = functools.partial(baseline_kernel, num_positions=P)

    return pl.pallas_call(
        kernel,
        out_shape=jax.ShapeDtypeStruct((B, C_OUT), jnp.float32),
        grid_spec=pltpu.PrefetchScalarGridSpec(
            num_scalar_prefetch=0,
            grid=grid,
            in_specs=[
                pl.BlockSpec((TB, H * W), lambda b: (b, 0)),          # per-batch tile
                pl.BlockSpec((H * W, P * C_OUT), lambda b: (0, 0)),   # resident weight
                pl.BlockSpec((1, C_OUT), lambda b: (0, 0)),           # resident bias
            ],
            out_specs=pl.BlockSpec((TB, C_OUT), lambda b: (b, 0)),
        ),
        compiler_params=pltpu.CompilerParams(
            dimension_semantics=("parallel",)),
    )(x_flat, w_exp, b2)


def reference_forward(x, weight, bias):
    # Pure-XLA reference used only for a correctness sanity check.
    y = jax.lax.conv_general_dilated(
        x.astype(jnp.float32), weight.astype(jnp.float32),
        window_strides=(1, 1), padding="VALID",
        dimension_numbers=("NCHW", "OIHW", "NCHW"))
    y = jnp.tanh(y + bias[None, :, None, None])
    y = jnp.max(y, axis=-1)
    y = jnp.max(y, axis=-1)
    return y


if __name__ == "__main__":
    key = jax.random.PRNGKey(0)
    kx, kw, kb = jax.random.split(key, 3)

    # Small shapes consistent with the module: 1 input channel, H,W >= 28.
    # 32x32 gives a 5x5 conv output so the two max reductions are non-trivial.
    B, H, W = 2, 32, 32
    x = jax.random.normal(kx, (B, C_IN, H, W), dtype=jnp.float32)

    # Deterministic synthetic Conv2d params (torch-style uniform(-1/sqrt(fan_in), ...)).
    fan_in = C_IN * KH * KW
    bound = 1.0 / (fan_in ** 0.5)
    weight = jax.random.uniform(kw, (C_OUT, C_IN, KH, KW), jnp.float32, -bound, bound)
    bias = jax.random.uniform(kb, (C_OUT,), jnp.float32, -bound, bound)

    fwd = jax.jit(baseline_forward)
    out = jax.block_until_ready(fwd(x, weight, bias))
    ref = reference_forward(x, weight, bias)

    assert out.shape == (B, C_OUT), out.shape
    assert jnp.allclose(out, ref, atol=1e-4, rtol=1e-4), (
        f"max abs err = {jnp.max(jnp.abs(out - ref))}")
    print("KERNEL_OK")
</pallas_src>

<mosaic_0001>
module attributes {stable_mosaic.version = 11 : i64} {
  func.func @baseline_kernel(%arg0: i32, %arg1: memref<2x1024xf32, #tpu.memory_space<vmem>>, %arg2: memref<1024x250xf32, #tpu.memory_space<vmem>>, %arg3: memref<1x10xf32, #tpu.memory_space<vmem>>, %arg4: memref<2x10xf32, #tpu.memory_space<vmem>>) attributes {dimension_semantics = [#tpu.dimension_semantics<parallel>], iteration_bounds = array<i64: 1>, scalar_prefetch = 0 : i64, scratch_operands = 0 : i64, tpu.core_type = #tpu.core_type<tc>, window_params = [{transform_indices = @transform_0, window_bounds = array<i64: 2, 1024>}, {pipeline_mode = #tpu.pipeline_mode<synchronous>, transform_indices = @transform_1, window_bounds = array<i64: 1024, 250>}, {pipeline_mode = #tpu.pipeline_mode<synchronous>, transform_indices = @transform_2, window_bounds = array<i64: 1, 10>}, {transform_indices = @transform_3, window_bounds = array<i64: 2, 10>}]} {
    %c0 = arith.constant 0 : index
    %c0_0 = arith.constant 0 : index
    %0 = vector.load %arg1[%c0, %c0_0] : memref<2x1024xf32, #tpu.memory_space<vmem>>, vector<2x1024xf32>
    %c0_1 = arith.constant 0 : index
    %c0_2 = arith.constant 0 : index
    %1 = vector.load %arg2[%c0_1, %c0_2] : memref<1024x250xf32, #tpu.memory_space<vmem>>, vector<1024x250xf32>
    %cst = arith.constant dense<0.000000e+00> : vector<2x250xf32>
    %2 = tpu.matmul %0, %1, %cst {dimension_numbers = #tpu.dot_dimension_numbers<[1], [0], [0], [1], [0, 0, 1, 1], [], []>} : vector<2x1024xf32>, vector<1024x250xf32>, vector<2x250xf32> -> vector<2x250xf32>
    %3 = vector.extract_strided_slice %2 {offsets = [0, 0], sizes = [2, 10], strides = [1, 1]} : vector<2x250xf32> to vector<2x10xf32>
    %4 = vector.extract_strided_slice %2 {offsets = [0, 10], sizes = [2, 10], strides = [1, 1]} : vector<2x250xf32> to vector<2x10xf32>
    %5 = arith.maximumf %3, %4 : vector<2x10xf32>
    %6 = vector.extract_strided_slice %2 {offsets = [0, 20], sizes = [2, 10], strides = [1, 1]} : vector<2x250xf32> to vector<2x10xf32>
    %7 = arith.maximumf %5, %6 : vector<2x10xf32>
    %8 = vector.extract_strided_slice %2 {offsets = [0, 30], sizes = [2, 10], strides = [1, 1]} : vector<2x250xf32> to vector<2x10xf32>
    %9 = arith.maximumf %7, %8 : vector<2x10xf32>
    %10 = vector.extract_strided_slice %2 {offsets = [0, 40], sizes = [2, 10], strides = [1, 1]} : vector<2x250xf32> to vector<2x10xf32>
    %11 = arith.maximumf %9, %10 : vector<2x10xf32>
    %12 = vector.extract_strided_slice %2 {offsets = [0, 50], sizes = [2, 10], strides = [1, 1]} : vector<2x250xf32> to vector<2x10xf32>
    %13 = arith.maximumf %11, %12 : vector<2x10xf32>
    %14 = vector.extract_strided_slice %2 {offsets = [0, 60], sizes = [2, 10], strides = [1, 1]} : vector<2x250xf32> to vector<2x10xf32>
    %15 = arith.maximumf %13, %14 : vector<2x10xf32>
    %16 = vector.extract_strided_slice %2 {offsets = [0, 70], sizes = [2, 10], strides = [1, 1]} : vector<2x250xf32> to vector<2x10xf32>
    %17 = arith.maximumf %15, %16 : vector<2x10xf32>
    %18 = vector.extract_strided_slice %2 {offsets = [0, 80], sizes = [2, 10], strides = [1, 1]} : vector<2x250xf32> to vector<2x10xf32>
    %19 = arith.maximumf %17, %18 : vector<2x10xf32>
    %20 = vector.extract_strided_slice %2 {offsets = [0, 90], sizes = [2, 10], strides = [1, 1]} : vector<2x250xf32> to vector<2x10xf32>
    %21 = arith.maximumf %19, %20 : vector<2x10xf32>
    %22 = vector.extract_strided_slice %2 {offsets = [0, 100], sizes = [2, 10], strides = [1, 1]} : vector<2x250xf32> to vector<2x10xf32>
    %23 = arith.maximumf %21, %22 : vector<2x10xf32>
    %24 = vector.extract_strided_slice %2 {offsets = [0, 110], sizes = [2, 10], strides = [1, 1]} : vector<2x250xf32> to vector<2x10xf32>
    %25 = arith.maximumf %23, %24 : vector<2x10xf32>
    %26 = vector.extract_strided_slice %2 {offsets = [0, 120], sizes = [2, 10], strides = [1, 1]} : vector<2x250xf32> to vector<2x10xf32>
    %27 = arith.maximumf %25, %26 : vector<2x10xf32>
    %28 = vector.extract_strided_slice %2 {offsets = [0, 130], sizes = [2, 10], strides = [1, 1]} : vector<2x250xf32> to vector<2x10xf32>
    %29 = arith.maximumf %27, %28 : vector<2x10xf32>
    %30 = vector.extract_strided_slice %2 {offsets = [0, 140], sizes = [2, 10], strides = [1, 1]} : vector<2x250xf32> to vector<2x10xf32>
    %31 = arith.maximumf %29, %30 : vector<2x10xf32>
    %32 = vector.extract_strided_slice %2 {offsets = [0, 150], sizes = [2, 10], strides = [1, 1]} : vector<2x250xf32> to vector<2x10xf32>
    %33 = arith.maximumf %31, %32 : vector<2x10xf32>
    %34 = vector.extract_strided_slice %2 {offsets = [0, 160], sizes = [2, 10], strides = [1, 1]} : vector<2x250xf32> to vector<2x10xf32>
    %35 = arith.maximumf %33, %34 : vector<2x10xf32>
    %36 = vector.extract_strided_slice %2 {offsets = [0, 170], sizes = [2, 10], strides = [1, 1]} : vector<2x250xf32> to vector<2x10xf32>
    %37 = arith.maximumf %35, %36 : vector<2x10xf32>
    %38 = vector.extract_strided_slice %2 {offsets = [0, 180], sizes = [2, 10], strides = [1, 1]} : vector<2x250xf32> to vector<2x10xf32>
    %39 = arith.maximumf %37, %38 : vector<2x10xf32>
    %40 = vector.extract_strided_slice %2 {offsets = [0, 190], sizes = [2, 10], strides = [1, 1]} : vector<2x250xf32> to vector<2x10xf32>
    %41 = arith.maximumf %39, %40 : vector<2x10xf32>
    %42 = vector.extract_strided_slice %2 {offsets = [0, 200], sizes = [2, 10], strides = [1, 1]} : vector<2x250xf32> to vector<2x10xf32>
    %43 = arith.maximumf %41, %42 : vector<2x10xf32>
    %44 = vector.extract_strided_slice %2 {offsets = [0, 210], sizes = [2, 10], strides = [1, 1]} : vector<2x250xf32> to vector<2x10xf32>
    %45 = arith.maximumf %43, %44 : vector<2x10xf32>
    %46 = vector.extract_strided_slice %2 {offsets = [0, 220], sizes = [2, 10], strides = [1, 1]} : vector<2x250xf32> to vector<2x10xf32>
    %47 = arith.maximumf %45, %46 : vector<2x10xf32>
    %48 = vector.extract_strided_slice %2 {offsets = [0, 230], sizes = [2, 10], strides = [1, 1]} : vector<2x250xf32> to vector<2x10xf32>
    %49 = arith.maximumf %47, %48 : vector<2x10xf32>
    %50 = vector.extract_strided_slice %2 {offsets = [0, 240], sizes = [2, 10], strides = [1, 1]} : vector<2x250xf32> to vector<2x10xf32>
    %51 = arith.maximumf %49, %50 : vector<2x10xf32>
    %c0_3 = arith.constant 0 : index
    %c0_4 = arith.constant 0 : index
    %52 = vector.load %arg3[%c0_3, %c0_4] : memref<1x10xf32, #tpu.memory_space<vmem>>, vector<1x10xf32>
    %53 = vector.broadcast %52 : vector<1x10xf32> to vector<2x10xf32>
    %54 = arith.addf %51, %53 : vector<2x10xf32>
    %55 = math.tanh %54 : vector<2x10xf32>
    %c0_5 = arith.constant 0 : index
    %c0_6 = arith.constant 0 : index
    %56 = vector.load %arg4[%c0_5, %c0_6] : memref<2x10xf32, #tpu.memory_space<vmem>>, vector<2x10xf32>
    tpu.vector_store %arg4[%c0_5, %c0_6], %55 {strides = array<i32>} : memref<2x10xf32, #tpu.memory_space<vmem>>, vector<2x10xf32>,
    return
  }
  func.func @transform_0(%arg0: i32) -> (i32, i32) {
    %c0_i32 = arith.constant 0 : i32
    %c0_i32_0 = arith.constant 0 : i32
    return %arg0, %c0_i32 : i32, i32
  }
  func.func @transform_1(%arg0: i32) -> (i32, i32) {
    %c0_i32 = arith.constant 0 : i32
    %c0_i32_0 = arith.constant 0 : i32
    %c0_i32_1 = arith.constant 0 : i32
    return %c0_i32, %c0_i32_0 : i32, i32
  }
  func.func @transform_2(%arg0: i32) -> (i32, i32) {
    %c0_i32 = arith.constant 0 : i32
    %c0_i32_0 = arith.constant 0 : i32
    %c0_i32_1 = arith.constant 0 : i32
    return %c0_i32, %c0_i32_0 : i32, i32
  }
  func.func @transform_3(%arg0: i32) -> (i32, i32) {
    %c0_i32 = arith.constant 0 : i32
    %c0_i32_0 = arith.constant 0 : i32
    return %arg0, %c0_i32 : i32, i32
  }
}

</mosaic_0001>

<bundles_post_ra>
// kernel: baseline_forward.1
= control target key start
LH: loop header
LB: loop body
LE: loop exit
PB: predicated region body
PF: predicated region fallthrough
CT: control target
= control target key end

     0   :  { %s1916_s0 = inlined_call_operand.vmem [shape: f32[2,1024], index: 0, kind: input, shape index: {}]   ;;  %s1917_s1 = inlined_call_operand.vmem [shape: f32[1024,250], index: 1, kind: input, shape index: {}]   ;;  %s1918_s2 = inlined_call_operand.vmem [shape: f32[1,10], index: 2, kind: input, shape index: {}]   ;;  %s1919_s3 = inlined_call_operand.hbm [shape: f32[2,10], index: 3, kind: output, shape index: {}]  }
   0x1   :  { %v18_v0 = vld [vmem:[%s1917_s1 + $0x8] sm:$0xff]  ;;  %v20_v1 = vld [vmem:[%s1917_s1 + $0x18] sm:$0xff]  ;;  %v17_v5 = vld [vmem:[%s1917_s1] sm:$0xff] }
   0x2   :  { %v146_v2 = vld [vmem:[%s1917_s1 + $0x408] sm:$0xff]  ;;  %v729_v3 = vpack.c.bf16 %v20_v1, %v18_v0  ;;  %v148_v4 = vld [vmem:[%s1917_s1 + $0x418] sm:$0xff]  ;;  %v19_v6 = vld [vmem:[%s1917_s1 + $0x10] sm:$0xff] }
   0x3   :  { %v857_v7 = vpack.c.bf16 %v148_v4, %v146_v2  ;;  %v731_v8 = vpack.c.bf16 %v19_v6, %v17_v5  ;;  %v145_v9 = vld [vmem:[%s1917_s1 + $0x400] sm:$0xff]  ;;  %v147_v10 = vld [vmem:[%s1917_s1 + $0x410] sm:$0xff]  ;;  %v22_v11 = vld [vmem:[%s1917_s1 + $0x28] sm:$0xff] }
   0x4   :  { %730 = vmatprep.subr.bf16.mxu1 %v729_v3  ;;  %v859_v12 = vpack.c.bf16 %v147_v10, %v145_v9  ;;  %v24_v13 = vld [vmem:[%s1917_s1 + $0x38] sm:$0xff]  ;;  %v150_v14 = vld [vmem:[%s1917_s1 + $0x428] sm:$0xff]  ;;  %v21_v18 = vld [vmem:[%s1917_s1 + $0x20] sm:$0xff] }
   0x5   :  { %v152_v15 = vld [vmem:[%s1917_s1 + $0x438] sm:$0xff]  ;;  %858 = vmatprep.subr.bf16.mxu0 %v857_v7  ;;  %732 = vmatpush1.bf16.msra.mxu1 %v731_v8  ;;  %v733_v16 = vpack.c.bf16 %v24_v13, %v22_v11  ;;  %v23_v19 = vld [vmem:[%s1917_s1 + $0x30] sm:$0xff]  ;;  %v149_v20 = vld [vmem:[%s1917_s1 + $0x420] sm:$0xff] }
   0x6   :  { %v861_v17 = vpack.c.bf16 %v152_v15, %v150_v14  ;;  %860 = vmatpush1.bf16.msra.mxu0 %v859_v12  ;;  %v735_v21 = vpack.c.bf16 %v23_v19, %v21_v18  ;;  %v151_v22 = vld [vmem:[%s1917_s1 + $0x430] sm:$0xff]  ;;  %v26_v23 = vld [vmem:[%s1917_s1 + $0x48] sm:$0xff]  ;;  %v28_v24 = vld [vmem:[%s1917_s1 + $0x58] sm:$0xff] }
   0x7   :  { %734 = vmatprep.subr.bf16.mxu1 %v733_v16  ;;  %v863_v25 = vpack.c.bf16 %v151_v22, %v149_v20  ;;  %v737_v26 = vpack.c.bf16 %v28_v24, %v26_v23  ;;  %v154_v27 = vld [vmem:[%s1917_s1 + $0x448] sm:$0xff]  ;;  %v156_v28 = vld [vmem:[%s1917_s1 + $0x458] sm:$0xff]  ;;  %v25_v29 = vld [vmem:[%s1917_s1 + $0x40] sm:$0xff] }
   0x8   :  { %862 = vmatprep.subr.bf16.mxu0 %v861_v17  ;;  %v865_v30 = vpack.c.bf16 %v156_v28, %v154_v27  ;;  %v27_v31 = vld [vmem:[%s1917_s1 + $0x50] sm:$0xff]  ;;  %v153_v32 = vld [vmem:[%s1917_s1 + $0x440] sm:$0xff]  ;;  %v30_v35 = vld [vmem:[%s1917_s1 + $0x68] sm:$0xff] }
   0x9   :  { %v155_v33 = vld [vmem:[%s1917_s1 + $0x450] sm:$0xff]  ;;  %736 = vmatpush1.bf16.msra.mxu1 %v735_v21  ;;  %v739_v34 = vpack.c.bf16 %v27_v31, %v25_v29  ;;  %v32_v36 = vld [vmem:[%s1917_s1 + $0x78] sm:$0xff]  ;;  %v158_v37 = vld [vmem:[%s1917_s1 + $0x468] sm:$0xff] }
   0xa   :  { %864 = vmatpush1.bf16.msra.mxu0 %v863_v25  ;;  %738 = vmatprep.subr.bf16.mxu1 %v737_v26  ;;  %v867_v38 = vpack.c.bf16 %v155_v33, %v153_v32  ;;  %v741_v39 = vpack.c.bf16 %v32_v36, %v30_v35  ;;  %v160_v40 = vld [vmem:[%s1917_s1 + $0x478] sm:$0xff]  ;;  %v29_v41 = vld [vmem:[%s1917_s1 + $0x60] sm:$0xff]  ;;  %v31_v42 = vld [vmem:[%s1917_s1 + $0x70] sm:$0xff] }
   0xb   :  { %866 = vmatprep.subr.bf16.mxu0 %v865_v30  ;;  %v869_v43 = vpack.c.bf16 %v160_v40, %v158_v37  ;;  %v157_v44 = vld [vmem:[%s1917_s1 + $0x460] sm:$0xff]  ;;  %v159_v45 = vld [vmem:[%s1917_s1 + $0x470] sm:$0xff]  ;;  %v34_v46 = vld [vmem:[%s1917_s1 + $0x88] sm:$0xff]  ;;  %v743_v50 = vpack.c.bf16 %v31_v42, %v29_v41 }
   0xc   :  { %v36_v47 = vld [vmem:[%s1917_s1 + $0x98] sm:$0xff]  ;;  %v162_v48 = vld [vmem:[%s1917_s1 + $0x488] sm:$0xff]  ;;  %v871_v51 = vpack.c.bf16 %v159_v45, %v157_v44  ;;  %v33_v53 = vld [vmem:[%s1917_s1 + $0x80] sm:$0xff] }
   0xd   :  { %v164_v49 = vld [vmem:[%s1917_s1 + $0x498] sm:$0xff]  ;;  %740 = vmatpush1.bf16.msra.mxu1 %v739_v34  ;;  %v745_v52 = vpack.c.bf16 %v36_v47, %v34_v46  ;;  %v35_v54 = vld [vmem:[%s1917_s1 + $0x90] sm:$0xff]  ;;  %v161_v55 = vld [vmem:[%s1917_s1 + $0x480] sm:$0xff]  ;;  %v1045_v46 = vmov 1983009808  }
   0xe   :  { %868 = vmatpush1.bf16.msra.mxu0 %v867_v38  ;;  %742 = vmatprep.subr.bf16.mxu1 %v741_v39  ;;  %v873_v56 = vpack.c.bf16 %v164_v49, %v162_v48  ;;  %v163_v57 = vld [vmem:[%s1917_s1 + $0x490] sm:$0xff]  ;;  %v38_v58 = vld [vmem:[%s1917_s1 + $0xa8] sm:$0xff]  ;;  %v40_v59 = vld [vmem:[%s1917_s1 + $0xb8] sm:$0xff]  ;;  %v747_v62 = vpack.c.bf16 %v35_v54, %v33_v53  ;;  %v277_v47 = vunpack.c.l.s4 %v1045_v46  ;;  %v279_v48 = vlaneseq }
   0xf   :  { %870 = vmatprep.subr.bf16.mxu0 %v869_v43  ;;  %v166_v60 = vld [vmem:[%s1917_s1 + $0x4a8] sm:$0xff]  ;;  %v168_v61 = vld [vmem:[%s1917_s1 + $0x4b8] sm:$0xff]  ;;  %v875_v63 = vpack.c.bf16 %v163_v57, %v161_v55  ;;  %v749_v0 = vpack.c.bf16 %v40_v59, %v38_v58  ;;  %v37_v1 = vld [vmem:[%s1917_s1 + $0xa0] sm:$0xff] }
  0x10   :  { %v39_v2 = vld [vmem:[%s1917_s1 + $0xb0] sm:$0xff]  ;;  %v165_v3 = vld [vmem:[%s1917_s1 + $0x4a0] sm:$0xff]  ;;  %v877_v4 = vpack.c.bf16 %v168_v61, %v166_v60  ;;  %v42_v6 = vld [vmem:[%s1917_s1 + $0xc8] sm:$0xff]  ;;  %v278_v61 = vunpack.c.0.s8 %v277_v47 }
  0x11   :  { %744 = vmatpush1.bf16.msra.mxu1 %v743_v50  ;;  %v167_v5 = vld [vmem:[%s1917_s1 + $0x4b0] sm:$0xff]  ;;  %v44_v7 = vld [vmem:[%s1917_s1 + $0xd8] sm:$0xff]  ;;  %v170_v8 = vld [vmem:[%s1917_s1 + $0x4c8] sm:$0xff]  ;;  %v751_v10 = vpack.c.bf16 %v39_v2, %v37_v1 }
  0x12   :  { %872 = vmatpush1.bf16.msra.mxu0 %v871_v51  ;;  %746 = vmatprep.subr.bf16.mxu1 %v745_v52  ;;  %v172_v9 = vld [vmem:[%s1917_s1 + $0x4d8] sm:$0xff]  ;;  %v879_v11 = vpack.c.bf16 %v167_v5, %v165_v3  ;;  %v753_v12 = vpack.c.bf16 %v44_v7, %v42_v6  ;;  %v41_v13 = vld [vmem:[%s1917_s1 + $0xc0] sm:$0xff]  ;;  %v43_v14 = vld [vmem:[%s1917_s1 + $0xd0] sm:$0xff] }
  0x13   :  { %874 = vmatprep.subr.bf16.mxu0 %v873_v56  ;;  %v169_v15 = vld [vmem:[%s1917_s1 + $0x4c0] sm:$0xff]  ;;  %v881_v16 = vpack.c.bf16 %v172_v9, %v170_v8  ;;  %v171_v17 = vld [vmem:[%s1917_s1 + $0x4d0] sm:$0xff]  ;;  %v46_v18 = vld [vmem:[%s1917_s1 + $0xe8] sm:$0xff]  ;;  %v755_v22 = vpack.c.bf16 %v43_v14, %v41_v13 }
  0x14   :  { %v48_v19 = vld [vmem:[%s1917_s1 + $0xf8] sm:$0xff]  ;;  %v174_v20 = vld [vmem:[%s1917_s1 + $0x4e8] sm:$0xff]  ;;  %v883_v23 = vpack.c.bf16 %v171_v17, %v169_v15  ;;  %v45_v25 = vld [vmem:[%s1917_s1 + $0xe0] sm:$0xff] }
  0x15   :  { %748 = vmatpush1.bf16.msra.mxu1 %v747_v62  ;;  %v176_v21 = vld [vmem:[%s1917_s1 + $0x4f8] sm:$0xff]  ;;  %v757_v24 = vpack.c.bf16 %v48_v19, %v46_v18  ;;  %v47_v26 = vld [vmem:[%s1917_s1 + $0xf0] sm:$0xff]  ;;  %v173_v27 = vld [vmem:[%s1917_s1 + $0x4e0] sm:$0xff]  ;;  %v280_v62 = vshrl.u32 %v279_v48, 7 }
  0x16   :  { %876 = vmatpush1.bf16.msra.mxu0 %v875_v63  ;;  %750 = vmatprep.subr.bf16.mxu1 %v749_v0  ;;  %v885_v28 = vpack.c.bf16 %v176_v21, %v174_v20  ;;  %v175_v29 = vld [vmem:[%s1917_s1 + $0x4f0] sm:$0xff]  ;;  %v50_v30 = vld [vmem:[%s1917_s1 + $0x108] sm:$0xff]  ;;  %v52_v31 = vld [vmem:[%s1917_s1 + $0x118] sm:$0xff]  ;;  %v759_v34 = vpack.c.bf16 %v47_v26, %v45_v25 }
  0x17   :  { %878 = vmatprep.subr.bf16.mxu0 %v877_v4  ;;  %v178_v32 = vld [vmem:[%s1917_s1 + $0x508] sm:$0xff]  ;;  %v180_v33 = vld [vmem:[%s1917_s1 + $0x518] sm:$0xff]  ;;  %v887_v35 = vpack.c.bf16 %v175_v29, %v173_v27  ;;  %v761_v36 = vpack.c.bf16 %v52_v31, %v50_v30  ;;  %v49_v37 = vld [vmem:[%s1917_s1 + $0x100] sm:$0xff] }
  0x18   :  { %v51_v38 = vld [vmem:[%s1917_s1 + $0x110] sm:$0xff]  ;;  %v177_v39 = vld [vmem:[%s1917_s1 + $0x500] sm:$0xff]  ;;  %v889_v40 = vpack.c.bf16 %v180_v33, %v178_v32  ;;  %v54_v42 = vld [vmem:[%s1917_s1 + $0x128] sm:$0xff] }
  0x19   :  { %752 = vmatpush1.bf16.msra.mxu1 %v751_v10  ;;  %v179_v41 = vld [vmem:[%s1917_s1 + $0x510] sm:$0xff]  ;;  %v56_v43 = vld [vmem:[%s1917_s1 + $0x138] sm:$0xff]  ;;  %v182_v44 = vld [vmem:[%s1917_s1 + $0x528] sm:$0xff]  ;;  %v763_v49 = vpack.c.bf16 %v51_v38, %v49_v37 }
  0x1a   :  { %880 = vmatpush1.bf16.msra.mxu0 %v879_v11  ;;  %754 = vmatprep.subr.bf16.mxu1 %v753_v12  ;;  %v184_v45 = vld [vmem:[%s1917_s1 + $0x538] sm:$0xff]  ;;  %v891_v50 = vpack.c.bf16 %v179_v41, %v177_v39  ;;  %v765_v51 = vpack.c.bf16 %v56_v43, %v54_v42  ;;  %v53_v52 = vld [vmem:[%s1917_s1 + $0x120] sm:$0xff]  ;;  %v55_v53 = vld [vmem:[%s1917_s1 + $0x130] sm:$0xff]  ;;  %v1367_v11 = vsub.s32 %v278_v61, %v280_v62 }
  0x1b   :  { %882 = vmatprep.subr.bf16.mxu0 %v881_v16  ;;  %v181_v54 = vld [vmem:[%s1917_s1 + $0x520] sm:$0xff]  ;;  %v893_v55 = vpack.c.bf16 %v184_v45, %v182_v44  ;;  %v183_v56 = vld [vmem:[%s1917_s1 + $0x530] sm:$0xff]  ;;  %v58_v57 = vld [vmem:[%s1917_s1 + $0x148] sm:$0xff]  ;;  %v767_v63 = vpack.c.bf16 %v55_v53, %v53_v52 }
  0x1c   :  { %v60_v58 = vld [vmem:[%s1917_s1 + $0x158] sm:$0xff]  ;;  %v186_v59 = vld [vmem:[%s1917_s1 + $0x548] sm:$0xff]  ;;  %v895_v0 = vpack.c.bf16 %v183_v56, %v181_v54  ;;  %v57_v2 = vld [vmem:[%s1917_s1 + $0x140] sm:$0xff] }
  0x1d   :  { %756 = vmatpush1.bf16.msra.mxu1 %v755_v22  ;;  %v188_v60 = vld [vmem:[%s1917_s1 + $0x558] sm:$0xff]  ;;  %v769_v1 = vpack.c.bf16 %v60_v58, %v58_v57  ;;  %v59_v3 = vld [vmem:[%s1917_s1 + $0x150] sm:$0xff]  ;;  %v185_v4 = vld [vmem:[%s1917_s1 + $0x540] sm:$0xff] }
  0x1e   :  { %884 = vmatpush1.bf16.msra.mxu0 %v883_v23  ;;  %758 = vmatprep.subr.bf16.mxu1 %v757_v24  ;;  %v897_v5 = vpack.c.bf16 %v188_v60, %v186_v59  ;;  %v187_v6 = vld [vmem:[%s1917_s1 + $0x550] sm:$0xff]  ;;  %v62_v7 = vld [vmem:[%s1917_s1 + $0x168] sm:$0xff]  ;;  %v64_v8 = vld [vmem:[%s1917_s1 + $0x178] sm:$0xff]  ;;  %v771_v12 = vpack.c.bf16 %v59_v3, %v57_v2 }
  0x1f   :  { %886 = vmatprep.subr.bf16.mxu0 %v885_v28  ;;  %v190_v9 = vld [vmem:[%s1917_s1 + $0x568] sm:$0xff]  ;;  %v192_v10 = vld [vmem:[%s1917_s1 + $0x578] sm:$0xff]  ;;  %v61_v13 = vld [vmem:[%s1917_s1 + $0x160] sm:$0xff]  ;;  %v899_v14 = vpack.c.bf16 %v187_v6, %v185_v4  ;;  %v773_v15 = vpack.c.bf16 %v64_v8, %v62_v7 }
  0x20   :  { %v63_v16 = vld [vmem:[%s1917_s1 + $0x170] sm:$0xff]  ;;  %v189_v17 = vld [vmem:[%s1917_s1 + $0x560] sm:$0xff]  ;;  %v901_v19 = vpack.c.bf16 %v192_v10, %v190_v9  ;;  %v66_v20 = vld [vmem:[%s1917_s1 + $0x188] sm:$0xff] }
  0x21   :  { %760 = vmatpush1.bf16.msra.mxu1 %v759_v34  ;;  %v191_v18 = vld [vmem:[%s1917_s1 + $0x570] sm:$0xff]  ;;  %v68_v21 = vld [vmem:[%s1917_s1 + $0x198] sm:$0xff]  ;;  %v1390_v22 = vld [vmem:[%s1916_s0] sm:$0xff]  ;;  %v775_v27 = vpack.c.bf16 %v63_v16, %v61_v13 }
  0x22   :  { %888 = vmatpush1.bf16.msra.mxu0 %v887_v35  ;;  %762 = vmatprep.subr.bf16.mxu1 %v761_v36  ;;  %v194_v23 = vld [vmem:[%s1917_s1 + $0x588] sm:$0xff]  ;;  %v196_v24 = vld [vmem:[%s1917_s1 + $0x598] sm:$0xff]  ;;  %v1400_v25 = vrot.slane %v1390_v22, %v1367_v11  ;;  %v903_v29 = vpack.c.bf16 %v191_v18, %v189_v17  ;;  %v777_v30 = vpack.c.bf16 %v68_v21, %v66_v20  ;;  %v65_v31 = vld [vmem:[%s1917_s1 + $0x180] sm:$0xff] }
  0x23   :  { %890 = vmatprep.subr.bf16.mxu0 %v889_v40  ;;  %v1405_v26 = vld [vmem:[%s1916_s0 + $0x8] sm:$0xff]  ;;  %v67_v32 = vld [vmem:[%s1917_s1 + $0x190] sm:$0xff]  ;;  %v193_v33 = vld [vmem:[%s1917_s1 + $0x580] sm:$0xff]  ;;  %v905_v35 = vpack.c.bf16 %v196_v24, %v194_v23  ;;  %v275_v10 = vcombine.high %v1390_v22, %v1390_v22 }
  0x24   :  { %v1409_v28 = vrot.slane %v1405_v26, %v1367_v11  ;;  %v290_v34 = vcombine.high %v1400_v25, %v1400_v25  ;;  %v195_v36 = vld [vmem:[%s1917_s1 + $0x590] sm:$0xff]  ;;  %v70_v37 = vld [vmem:[%s1917_s1 + $0x1a8] sm:$0xff]  ;;  %v72_v38 = vld [vmem:[%s1917_s1 + $0x1b8] sm:$0xff]  ;;  %v779_v42 = vpack.c.bf16 %v67_v32, %v65_v31 }
  0x25   :  { %764 = vmatpush1.bf16.msra.mxu1 %v763_v49  ;;  %v198_v40 = vld [vmem:[%s1917_s1 + $0x5a8] sm:$0xff]  ;;  %v200_v41 = vld [vmem:[%s1917_s1 + $0x5b8] sm:$0xff]  ;;  %v907_v43 = vpack.c.bf16 %v195_v36, %v193_v33  ;;  %v781_v44 = vpack.c.bf16 %v72_v38, %v70_v37  ;;  %v69_v45 = vld [vmem:[%s1917_s1 + $0x1a0] sm:$0xff] }
  0x26   :  { %892 = vmatpush1.bf16.msra.mxu0 %v891_v50  ;;  %766 = vmatprep.subr.bf16.mxu1 %v765_v51  ;;  %v307_v39 = vcombine.high %v1409_v28, %v1409_v28  ;;  %v71_v46 = vld [vmem:[%s1917_s1 + $0x1b0] sm:$0xff]  ;;  %v197_v47 = vld [vmem:[%s1917_s1 + $0x5a0] sm:$0xff]  ;;  %v909_v48 = vpack.c.bf16 %v200_v41, %v198_v40  ;;  %v74_v50 = vld [vmem:[%s1917_s1 + $0x1c8] sm:$0xff] }
  0x27   :  { %894 = vmatprep.subr.bf16.mxu0 %v893_v55  ;;  %381 = vmatprep.mubr.f32.mxu1 %v290_v34  ;;  %v199_v49 = vld [vmem:[%s1917_s1 + $0x5b0] sm:$0xff]  ;;  %v76_v51 = vld [vmem:[%s1917_s1 + $0x1d8] sm:$0xff]  ;;  %v202_v52 = vld [vmem:[%s1917_s1 + $0x5c8] sm:$0xff]  ;;  %v783_v54 = vpack.c.bf16 %v71_v46, %v69_v45 }
  0x28   :  { %523 = vmatprep.mubr.f32.mxu0 %v307_v39  ;;  %v204_v53 = vld [vmem:[%s1917_s1 + $0x5d8] sm:$0xff]  ;;  %v911_v55 = vpack.c.bf16 %v199_v49, %v197_v47  ;;  %v785_v56 = vpack.c.bf16 %v76_v51, %v74_v50  ;;  %v73_v57 = vld [vmem:[%s1917_s1 + $0x1c0] sm:$0xff]  ;;  %v75_v58 = vld [vmem:[%s1917_s1 + $0x1d0] sm:$0xff] }
  0x29   :  { %768 = vmatpush1.bf16.msra.mxu1 %v767_v63  ;;  %v201_v59 = vld [vmem:[%s1917_s1 + $0x5c0] sm:$0xff]  ;;  %v913_v60 = vpack.c.bf16 %v204_v53, %v202_v52  ;;  %v203_v61 = vld [vmem:[%s1917_s1 + $0x5d0] sm:$0xff]  ;;  %v78_v62 = vld [vmem:[%s1917_s1 + $0x1e8] sm:$0xff]  ;;  %v787_v2 = vpack.c.bf16 %v75_v58, %v73_v57 }
  0x2a   :  { %896 = vmatpush1.bf16.msra.mxu0 %v895_v0  ;;  %770 = vmatprep.subr.bf16.mxu1 %v769_v1  ;;  %v80_v63 = vld [vmem:[%s1917_s1 + $0x1f8] sm:$0xff]  ;;  %v206_v0 = vld [vmem:[%s1917_s1 + $0x5e8] sm:$0xff]  ;;  %v915_v3 = vpack.c.bf16 %v203_v61, %v201_v59  ;;  %v79_v6 = vld [vmem:[%s1917_s1 + $0x1f0] sm:$0xff] }
  0x2b   :  { %898 = vmatprep.subr.bf16.mxu0 %v897_v5  ;;  %v208_v1 = vld [vmem:[%s1917_s1 + $0x5f8] sm:$0xff]  ;;  %v789_v4 = vpack.c.bf16 %v80_v63, %v78_v62  ;;  %v77_v5 = vld [vmem:[%s1917_s1 + $0x1e0] sm:$0xff]  ;;  %v207_v9 = vld [vmem:[%s1917_s1 + $0x5f0] sm:$0xff] }
  0x2c   :  { %v205_v7 = vld [vmem:[%s1917_s1 + $0x5e0] sm:$0xff]  ;;  %v917_v8 = vpack.c.bf16 %v208_v1, %v206_v0  ;;  %v84_v13 = vld [vmem:[%s1917_s1 + $0x218] sm:$0xff]  ;;  %v791_v17 = vpack.c.bf16 %v79_v6, %v77_v5  ;;  %v83_v21 = vld [vmem:[%s1917_s1 + $0x210] sm:$0xff] }
  0x2d   :  { %772 = vmatpush1.bf16.msra.mxu1 %v771_v12  ;;  %v82_v12 = vld [vmem:[%s1917_s1 + $0x208] sm:$0xff]  ;;  %v212_v16 = vld [vmem:[%s1917_s1 + $0x618] sm:$0xff]  ;;  %v919_v18 = vpack.c.bf16 %v207_v9, %v205_v7  ;;  %v81_v20 = vld [vmem:[%s1917_s1 + $0x200] sm:$0xff] }
  0x2e   :  { %900 = vmatpush1.bf16.msra.mxu0 %v899_v14  ;;  %774 = vmatprep.subr.bf16.mxu1 %v773_v15  ;;  %v292_v14 = vcombine.high %v1405_v26, %v1405_v26  ;;  %v210_v15 = vld [vmem:[%s1917_s1 + $0x608] sm:$0xff]  ;;  %v209_v22 = vld [vmem:[%s1917_s1 + $0x600] sm:$0xff]  ;;  %v211_v24 = vld [vmem:[%s1917_s1 + $0x610] sm:$0xff]  ;;  %v795_v33 = vpack.c.bf16 %v83_v21, %v81_v20 }
  0x2f   :  { %902 = vmatprep.subr.bf16.mxu0 %v901_v19  ;;  %v793_v19 = vpack.c.bf16 %v84_v13, %v82_v12  ;;  %v921_v23 = vpack.c.bf16 %v212_v16, %v210_v15  ;;  %v86_v26 = vld [vmem:[%s1917_s1 + $0x228] sm:$0xff]  ;;  %v216_v31 = vld [vmem:[%s1917_s1 + $0x638] sm:$0xff]  ;;  %v923_v34 = vpack.c.bf16 %v211_v24, %v209_v22  ;;  %v85_v36 = vld [vmem:[%s1917_s1 + $0x220] sm:$0xff] }
  0x30   :  { %v1543_v32 = vrot.slane %v292_v14, %v1367_v11  ;;  %v87_v37 = vld [vmem:[%s1917_s1 + $0x230] sm:$0xff]  ;;  %v213_v38 = vld [vmem:[%s1917_s1 + $0x620] sm:$0xff]  ;;  %v90_v40 = vld [vmem:[%s1917_s1 + $0x248] sm:$0xff] }
  0x31   :  { %776 = vmatpush1.bf16.msra.mxu1 %v775_v27  ;;  %v88_v27 = vld [vmem:[%s1917_s1 + $0x238] sm:$0xff]  ;;  %v215_v39 = vld [vmem:[%s1917_s1 + $0x630] sm:$0xff]  ;;  %v799_v46 = vpack.c.bf16 %v87_v37, %v85_v36  ;;  %v217_v50 = vld [vmem:[%s1917_s1 + $0x640] sm:$0xff] }
  0x32   :  { %904 = vmatpush1.bf16.msra.mxu0 %v903_v29  ;;  %778 = vmatprep.subr.bf16.mxu1 %v777_v30  ;;  %v1534_v29 = vrot.slane %v275_v10, %v1367_v11  ;;  %v214_v30 = vld [vmem:[%s1917_s1 + $0x628] sm:$0xff]  ;;  %v92_v41 = vld [vmem:[%s1917_s1 + $0x258] sm:$0xff]  ;;  %v308_v45 = vcombine.high %v1543_v32, %v1543_v32  ;;  %v927_v47 = vpack.c.bf16 %v215_v39, %v213_v38  ;;  %v91_v49 = vld [vmem:[%s1917_s1 + $0x250] sm:$0xff] }
  0x33   :  { %906 = vmatprep.subr.bf16.mxu0 %v905_v35  ;;  %v797_v35 = vpack.c.bf16 %v88_v27, %v86_v26  ;;  %v925_v11 = vpack.c.bf16 %v216_v31, %v214_v30  ;;  %v94_v52 = vld [vmem:[%s1917_s1 + $0x268] sm:$0xff]  ;;  %v96_v53 = vld [vmem:[%s1917_s1 + $0x278] sm:$0xff]  ;;  %v93_v59 = vld [vmem:[%s1917_s1 + $0x260] sm:$0xff] }
  0x34   :  { %v805_v58 = vpack.c.bf16 %v96_v53, %v94_v52  ;;  %v221_v61 = vld [vmem:[%s1917_s1 + $0x660] sm:$0xff]  ;;  %v223_v63 = vld [vmem:[%s1917_s1 + $0x670] sm:$0xff]  ;;  %v98_v0 = vld [vmem:[%s1917_s1 + $0x288] sm:$0xff] }
  0x35   :  { %780 = vmatpush1.bf16.msra.mxu1 %v779_v42  ;;  %v291_v42 = vcombine.high %v1534_v29, %v1534_v29  ;;  %v100_v1 = vld [vmem:[%s1917_s1 + $0x298] sm:$0xff]  ;;  %v935_v5 = vpack.c.bf16 %v223_v63, %v221_v61  ;;  %v97_v7 = vld [vmem:[%s1917_s1 + $0x280] sm:$0xff]  ;;  %v227_v12 = vld [vmem:[%s1917_s1 + $0x690] sm:$0xff] }
  0x36   :  { %908 = vmatpush1.bf16.msra.mxu0 %v907_v43  ;;  %782 = vmatprep.subr.bf16.mxu1 %v781_v44  ;;  %v218_v43 = vld [vmem:[%s1917_s1 + $0x648] sm:$0xff]  ;;  %v220_v44 = vld [vmem:[%s1917_s1 + $0x658] sm:$0xff]  ;;  %v809_v6 = vpack.c.bf16 %v100_v1, %v98_v0  ;;  %v225_v9 = vld [vmem:[%s1917_s1 + $0x680] sm:$0xff] }
  0x37   :  { %910 = vmatprep.subr.bf16.mxu0 %v909_v48  ;;  %v801_v48 = vpack.c.bf16 %v92_v41, %v90_v40  ;;  %v929_v51 = vpack.c.bf16 %v220_v44, %v218_v43  ;;  %v102_v13 = vld [vmem:[%s1917_s1 + $0x2a8] sm:$0xff]  ;;  %v104_v14 = vld [vmem:[%s1917_s1 + $0x2b8] sm:$0xff]  ;;  %v101_v20 = vld [vmem:[%s1917_s1 + $0x2a0] sm:$0xff] }
  0x38   :  { %v230_v15 = vld [vmem:[%s1917_s1 + $0x6a8] sm:$0xff]  ;;  %v232_v16 = vld [vmem:[%s1917_s1 + $0x6b8] sm:$0xff]  ;;  %v103_v21 = vld [vmem:[%s1917_s1 + $0x2b0] sm:$0xff] }
  0x39   :  { %784 = vmatpush1.bf16.msra.mxu1 %v783_v54  ;;  %v222_v54 = vld [vmem:[%s1917_s1 + $0x668] sm:$0xff]  ;;  %v229_v22 = vld [vmem:[%s1917_s1 + $0x6a0] sm:$0xff]  ;;  %v231_v24 = vld [vmem:[%s1917_s1 + $0x6b0] sm:$0xff] }
  0x3a   :  { %912 = vmatpush1.bf16.msra.mxu0 %v911_v55  ;;  %786 = vmatprep.subr.bf16.mxu1 %v785_v56  ;;  %v224_v55 = vld [vmem:[%s1917_s1 + $0x678] sm:$0xff]  ;;  %v106_v26 = vld [vmem:[%s1917_s1 + $0x2c8] sm:$0xff]  ;;  %v107_v37 = vld [vmem:[%s1917_s1 + $0x2d0] sm:$0xff] }
  0x3b   :  { %914 = vmatprep.subr.bf16.mxu0 %v913_v60  ;;  %v95_v60 = vld [vmem:[%s1917_s1 + $0x270] sm:$0xff]  ;;  %v933_v62 = vpack.c.bf16 %v224_v55, %v222_v54  ;;  %v108_v27 = vld [vmem:[%s1917_s1 + $0x2d8] sm:$0xff]  ;;  %v234_v30 = vld [vmem:[%s1917_s1 + $0x6c8] sm:$0xff] }
  0x3c   :  { %v236_v31 = vld [vmem:[%s1917_s1 + $0x6d8] sm:$0xff]  ;;  %v817_v36 = vpack.c.bf16 %v108_v27, %v106_v26  ;;  %v233_v38 = vld [vmem:[%s1917_s1 + $0x6c0] sm:$0xff]  ;;  %v110_v40 = vld [vmem:[%s1917_s1 + $0x2e8] sm:$0xff] }
  0x3d   :  { %788 = vmatpush1.bf16.msra.mxu1 %v787_v2  ;;  %v226_v2 = vld [vmem:[%s1917_s1 + $0x688] sm:$0xff]  ;;  %v945_v39 = vpack.c.bf16 %v236_v31, %v234_v30  ;;  %v112_v41 = vld [vmem:[%s1917_s1 + $0x2f8] sm:$0xff] }
  0x3e   :  { %916 = vmatpush1.bf16.msra.mxu0 %v915_v3  ;;  %790 = vmatprep.subr.bf16.mxu1 %v789_v4  ;;  %v228_v3 = vld [vmem:[%s1917_s1 + $0x698] sm:$0xff]  ;;  %v807_v4 = vpack.c.bf16 %v95_v60, %v93_v59 }
  0x3f   :  { %918 = vmatprep.subr.bf16.mxu0 %v917_v8  ;;  %v99_v8 = vld [vmem:[%s1917_s1 + $0x290] sm:$0xff]  ;;  %v937_v10 = vpack.c.bf16 %v228_v3, %v226_v2 }
  0x41   :  { %792 = vmatpush1.bf16.msra.mxu1 %v791_v17  ;;  %v811_v17 = vpack.c.bf16 %v99_v8, %v97_v7 }
  0x42   :  { %920 = vmatpush1.bf16.msra.mxu0 %v919_v18  ;;  %794 = vmatprep.subr.bf16.mxu1 %v793_v19  ;;  %v939_v18 = vpack.c.bf16 %v227_v12, %v225_v9  ;;  %v813_v19 = vpack.c.bf16 %v104_v14, %v102_v13 }
  0x43   :  { %922 = vmatprep.subr.bf16.mxu0 %v921_v23  ;;  %v941_v23 = vpack.c.bf16 %v232_v16, %v230_v15 }
  0x44   :  { %382 = vmatmul.mubr.f32.vlgmr.msra.gmra.mrb[0].mxu1 %v1400_v25  ;;  %v89_v25 = vld [vmem:[%s1917_s1 + $0x240] sm:$0xff] }
  0x45   :  { %796 = vmatpush1.bf16.msra.mxu1 %v795_v33  ;;  %524 = vmatmul.mubr.f32.vlgmr.msra.gmra.mrb[0].mxu0 %v1409_v28  ;;  %v219_v28 = vld [vmem:[%s1917_s1 + $0x650] sm:$0xff]  ;;  %v803_v56 = vpack.c.bf16 %v91_v49, %v89_v25  ;;  %v815_v33 = vpack.c.bf16 %v103_v21, %v101_v20 }
  0x46   :  { %924 = vmatpush1.bf16.msra.mxu0 %v923_v34  ;;  %798 = vmatprep.subr.bf16.mxu1 %v797_v35  ;;  %v931_v57 = vpack.c.bf16 %v219_v28, %v217_v50  ;;  %v105_v34 = vld [vmem:[%s1917_s1 + $0x2c0] sm:$0xff]  ;;  %v943_v35 = vpack.c.bf16 %v231_v24, %v229_v22 }
  0x47   :  { %926 = vmatprep.subr.bf16.mxu0 %v925_v11  ;;  %452 = vmatprep.mubr.f32.mxu1 %v291_v42  ;;  %v235_v11 = vld [vmem:[%s1917_s1 + $0x6d0] sm:$0xff] }
  0x48   :  { %594 = vmatprep.mubr.f32.mxu0 %v308_v45 }
  0x49   :  { %800 = vmatpush1.bf16.msra.mxu1 %v799_v46 }
  0x4a   :  { %928 = vmatpush1.bf16.msra.mxu0 %v927_v47  ;;  %802 = vmatprep.subr.bf16.mxu1 %v801_v48 }
  0x4b   :  { %930 = vmatprep.subr.bf16.mxu0 %v929_v51 }
  0x4d   :  { %804 = vmatpush1.bf16.msra.mxu1 %v803_v56 }
  0x4e   :  { %932 = vmatpush1.bf16.msra.mxu0 %v931_v57  ;;  %806 = vmatprep.subr.bf16.mxu1 %v805_v58 }
  0x4f   :  { %934 = vmatprep.subr.bf16.mxu0 %v933_v62 }
  0x51   :  { %808 = vmatpush1.bf16.msra.mxu1 %v807_v4 }
  0x52   :  { %936 = vmatpush1.bf16.msra.mxu0 %v935_v5  ;;  %810 = vmatprep.subr.bf16.mxu1 %v809_v6 }
  0x53   :  { %938 = vmatprep.subr.bf16.mxu0 %v937_v10 }
  0x55   :  { %812 = vmatpush1.bf16.msra.mxu1 %v811_v17 }
  0x56   :  { %940 = vmatpush1.bf16.msra.mxu0 %v939_v18  ;;  %814 = vmatprep.subr.bf16.mxu1 %v813_v19 }
  0x57   :  { %942 = vmatprep.subr.bf16.mxu0 %v941_v23 }
  0x58   :  { %8 = vsyncpa [#allocation3], 0  ;;  %v238_v42 = vld [vmem:[%s1917_s1 + $0x6e8] sm:$0xff]  ;;  %v240_v43 = vld [vmem:[%s1917_s1 + $0x6f8] sm:$0xff]  ;;  %v819_v44 = vpack.c.bf16 %v107_v37, %v105_v34  ;;  %v947_v45 = vpack.c.bf16 %v235_v11, %v233_v38  ;;  %v821_v46 = vpack.c.bf16 %v112_v41, %v110_v40  ;;  %s1046_s0 = smov 98   ;;  %s1048_s4 = smov 88  }
  0x59   :  { %816 = vmatpush1.bf16.msra.mxu1 %v815_v33  ;;  %v109_v47 = vld [vmem:[%s1917_s1 + $0x2e0] sm:$0xff]  ;;  %v111_v48 = vld [vmem:[%s1917_s1 + $0x2f0] sm:$0xff]  ;;  %v949_v49 = vpack.c.bf16 %v240_v43, %v238_v42  ;;  %v114_v51 = vld [vmem:[%s1917_s1 + $0x308] sm:$0xff]  ;;  %s1049_s5 = smov 108   ;;  %s1050_s6 = smov 68   ;;  %vm651_vm0 = vcmask 64512  }
  0x5a   :  { %944 = vmatpush1.bf16.msra.mxu0 %v943_v35  ;;  %818 = vmatprep.subr.bf16.mxu1 %v817_v36  ;;  %v237_v25 = vld [vmem:[%s1917_s1 + $0x6e0] sm:$0xff]  ;;  %v239_v50 = vld [vmem:[%s1917_s1 + $0x6f0] sm:$0xff]  ;;  %v116_v28 = vld [vmem:[%s1917_s1 + $0x318] sm:$0xff]  ;;  %v823_v54 = vpack.c.bf16 %v111_v48, %v109_v47  ;;  %s1051_s7 = smov 78   ;;  %s1052_s8 = smov 48   ;;  %vm712_vm1 = vcmask 74752  }
  0x5b   :  { %946 = vmatprep.subr.bf16.mxu0 %v945_v39  ;;  %v242_v52 = vld [vmem:[%s1917_s1 + $0x708] sm:$0xff]  ;;  %v244_v53 = vld [vmem:[%s1917_s1 + $0x718] sm:$0xff]  ;;  %v951_v55 = vpack.c.bf16 %v239_v50, %v237_v25  ;;  %v825_v56 = vpack.c.bf16 %v116_v28, %v114_v51  ;;  %v113_v57 = vld [vmem:[%s1917_s1 + $0x300] sm:$0xff]  ;;  %s1053_s9 = smov 58   ;;  %s1054_s10 = smov 28  }
  0x5c   :  { %v115_v58 = vld [vmem:[%s1917_s1 + $0x310] sm:$0xff]  ;;  %v241_v59 = vld [vmem:[%s1917_s1 + $0x700] sm:$0xff]  ;;  %v953_v60 = vpack.c.bf16 %v244_v53, %v242_v52  ;;  %v118_v62 = vld [vmem:[%s1917_s1 + $0x328] sm:$0xff]  ;;  %s1055_s11 = smov 38   ;;  %s1056_s12 = smov 8  }
  0x5d   :  { %820 = vmatpush1.bf16.msra.mxu1 %v819_v44  ;;  %v243_v61 = vld [vmem:[%s1917_s1 + $0x710] sm:$0xff]  ;;  %v120_v63 = vld [vmem:[%s1917_s1 + $0x338] sm:$0xff]  ;;  %v246_v0 = vld [vmem:[%s1917_s1 + $0x728] sm:$0xff]  ;;  %v827_v2 = vpack.c.bf16 %v115_v58, %v113_v57  ;;  %s1057_s13 = smov 18   ;;  %s1058_s14 = smov 126  }
  0x5e   :  { %948 = vmatpush1.bf16.msra.mxu0 %v947_v45  ;;  %822 = vmatprep.subr.bf16.mxu1 %v821_v46  ;;  %v248_v1 = vld [vmem:[%s1917_s1 + $0x738] sm:$0xff]  ;;  %v955_v3 = vpack.c.bf16 %v243_v61, %v241_v59  ;;  %v829_v4 = vpack.c.bf16 %v120_v63, %v118_v62  ;;  %v117_v5 = vld [vmem:[%s1917_s1 + $0x320] sm:$0xff]  ;;  %v119_v6 = vld [vmem:[%s1917_s1 + $0x330] sm:$0xff]  ;;  %s1059_s15 = smov 106   ;;  %s1060_s16 = smov 116  }
  0x5f   :  { %950 = vmatprep.subr.bf16.mxu0 %v949_v49  ;;  %v245_v7 = vld [vmem:[%s1917_s1 + $0x720] sm:$0xff]  ;;  %v957_v8 = vpack.c.bf16 %v248_v1, %v246_v0  ;;  %v247_v9 = vld [vmem:[%s1917_s1 + $0x730] sm:$0xff]  ;;  %v122_v10 = vld [vmem:[%s1917_s1 + $0x348] sm:$0xff]  ;;  %v831_v15 = vpack.c.bf16 %v119_v6, %v117_v5  ;;  %s1061_s17 = smov 86   ;;  %s1062_s18 = smov 96  }
  0x60   :  { %v124_v12 = vld [vmem:[%s1917_s1 + $0x358] sm:$0xff]  ;;  %v250_v13 = vld [vmem:[%s1917_s1 + $0x748] sm:$0xff]  ;;  %v959_v16 = vpack.c.bf16 %v247_v9, %v245_v7  ;;  %v121_v18 = vld [vmem:[%s1917_s1 + $0x340] sm:$0xff]  ;;  %s1063_s19 = smov 66   ;;  %s1064_s20 = smov 76  }
  0x61   :  { %824 = vmatpush1.bf16.msra.mxu1 %v823_v54  ;;  %v252_v14 = vld [vmem:[%s1917_s1 + $0x758] sm:$0xff]  ;;  %v833_v17 = vpack.c.bf16 %v124_v12, %v122_v10  ;;  %v123_v19 = vld [vmem:[%s1917_s1 + $0x350] sm:$0xff]  ;;  %v249_v20 = vld [vmem:[%s1917_s1 + $0x740] sm:$0xff]  ;;  %s1065_s21 = smov 46   ;;  %s1066_s22 = smov 56  }
  0x62   :  { %952 = vmatpush1.bf16.msra.mxu0 %v951_v55  ;;  %826 = vmatprep.subr.bf16.mxu1 %v825_v56  ;;  %v961_v21 = vpack.c.bf16 %v252_v14, %v250_v13  ;;  %v251_v22 = vld [vmem:[%s1917_s1 + $0x750] sm:$0xff]  ;;  %v126_v23 = vld [vmem:[%s1917_s1 + $0x368] sm:$0xff]  ;;  %v128_v24 = vld [vmem:[%s1917_s1 + $0x378] sm:$0xff]  ;;  %v835_v30 = vpack.c.bf16 %v123_v19, %v121_v18  ;;  %s1067_s23 = smov 26   ;;  %s1068_s24 = smov 36  }
  0x63   :  { %954 = vmatprep.subr.bf16.mxu0 %v953_v60  ;;  %v254_v26 = vld [vmem:[%s1917_s1 + $0x768] sm:$0xff]  ;;  %v256_v27 = vld [vmem:[%s1917_s1 + $0x778] sm:$0xff]  ;;  %v963_v31 = vpack.c.bf16 %v251_v22, %v249_v20  ;;  %v837_v33 = vpack.c.bf16 %v128_v24, %v126_v23  ;;  %v125_v34 = vld [vmem:[%s1917_s1 + $0x360] sm:$0xff]  ;;  %s1069_s25 = smov 16   ;;  %s1070_s28 = smov [#allocation2]  }
  0x64   :  { %v127_v35 = vld [vmem:[%s1917_s1 + $0x370] sm:$0xff]  ;;  %v253_v36 = vld [vmem:[%s1917_s1 + $0x760] sm:$0xff]  ;;  %v965_v37 = vpack.c.bf16 %v256_v27, %v254_v26  ;;  %v130_v11 = vld [vmem:[%s1917_s1 + $0x388] sm:$0xff]  ;;  %s720_s29 = sshll.u32 %s1070_s28, 4  ;;  %s721_s29 = int_to_ptr.vmem [resolvable:$true] %s720_s29 }
  0x65   :  { %828 = vmatpush1.bf16.msra.mxu1 %v827_v2  ;;  %v255_v38 = vld [vmem:[%s1917_s1 + $0x770] sm:$0xff]  ;;  %v132_v39 = vld [vmem:[%s1917_s1 + $0x398] sm:$0xff]  ;;  %v258_v40 = vld [vmem:[%s1917_s1 + $0x788] sm:$0xff]  ;;  %v839_v42 = vpack.c.bf16 %v127_v35, %v125_v34  ;;  %s1021_s30 = scalar_lea.vmem %s721_s29, 32  ;;  %p1026_p1 = scmp.lt.s32.totalorder %s721_s29, %s721_s29 }
  0x66   :  { %956 = vmatpush1.bf16.msra.mxu0 %v955_v3  ;;  %830 = vmatprep.subr.bf16.mxu1 %v829_v4  ;;  %v260_v41 = vld [vmem:[%s1917_s1 + $0x798] sm:$0xff]  ;;  %v967_v43 = vpack.c.bf16 %v255_v38, %v253_v36  ;;  %v841_v44 = vpack.c.bf16 %v132_v39, %v130_v11  ;;  %v129_v45 = vld [vmem:[%s1917_s1 + $0x380] sm:$0xff]  ;;  %v131_v46 = vld [vmem:[%s1917_s1 + $0x390] sm:$0xff]  ;;  %p1022_p0 = scmp.ne.s32.totalorder %s721_s29, %s1021_s30  ;;  %p1027_p2 = scmp.lt.s32.totalorder %s1021_s30, %s1021_s30 }
  0x67   :  { %958 = vmatprep.subr.bf16.mxu0 %v957_v8  ;;  %v257_v47 = vld [vmem:[%s1917_s1 + $0x780] sm:$0xff]  ;;  %v969_v48 = vpack.c.bf16 %v260_v41, %v258_v40  ;;  %v259_v25 = vld [vmem:[%s1917_s1 + $0x790] sm:$0xff]  ;;  %v134_v49 = vld [vmem:[%s1917_s1 + $0x3a8] sm:$0xff]  ;;  %v843_v52 = vpack.c.bf16 %v131_v46, %v129_v45 }
  0x68   :  { %v136_v50 = vld [vmem:[%s1917_s1 + $0x3b8] sm:$0xff]  ;;  %v262_v51 = vld [vmem:[%s1917_s1 + $0x7a8] sm:$0xff]  ;;  %v971_v53 = vpack.c.bf16 %v259_v25, %v257_v47  ;;  %v133_v55 = vld [vmem:[%s1917_s1 + $0x3a0] sm:$0xff]  ;;  %p1028_p3 = por %p1027_p2, %p1026_p1 }
  0x69   :  { %832 = vmatpush1.bf16.msra.mxu1 %v831_v15  ;;  %v264_v28 = vld [vmem:[%s1917_s1 + $0x7b8] sm:$0xff]  ;;  %v845_v54 = vpack.c.bf16 %v136_v50, %v134_v49  ;;  %v135_v56 = vld [vmem:[%s1917_s1 + $0x3b0] sm:$0xff]  ;;  %v261_v57 = vld [vmem:[%s1917_s1 + $0x7a0] sm:$0xff] }
  0x6a   :  { %960 = vmatpush1.bf16.msra.mxu0 %v959_v16  ;;  %834 = vmatprep.subr.bf16.mxu1 %v833_v17  ;;  %v973_v58 = vpack.c.bf16 %v264_v28, %v262_v51  ;;  %v263_v59 = vld [vmem:[%s1917_s1 + $0x7b0] sm:$0xff]  ;;  %v138_v60 = vld [vmem:[%s1917_s1 + $0x3c8] sm:$0xff]  ;;  %v140_v61 = vld [vmem:[%s1917_s1 + $0x3d8] sm:$0xff]  ;;  %v847_v0 = vpack.c.bf16 %v135_v56, %v133_v55  ;;  %p1029_p4 = pnand %p1028_p3, %p1022_p0 }
  0x6b   :  { %962 = vmatprep.subr.bf16.mxu0 %v961_v21  ;;  %v266_v62 = vld [vmem:[%s1917_s1 + $0x7c8] sm:$0xff]  ;;  %v268_v63 = vld [vmem:[%s1917_s1 + $0x7d8] sm:$0xff]  ;;  %v975_v1 = vpack.c.bf16 %v263_v59, %v261_v57  ;;  %v849_v2 = vpack.c.bf16 %v140_v61, %v138_v60  ;;  %v137_v3 = vld [vmem:[%s1917_s1 + $0x3c0] sm:$0xff] }
  0x6c   :  { %v139_v4 = vld [vmem:[%s1917_s1 + $0x3d0] sm:$0xff]  ;;  %v265_v5 = vld [vmem:[%s1917_s1 + $0x7c0] sm:$0xff]  ;;  %v977_v6 = vpack.c.bf16 %v268_v63, %v266_v62  ;;  %v142_v8 = vld [vmem:[%s1917_s1 + $0x3e8] sm:$0xff] }
  0x6d   :  { %836 = vmatpush1.bf16.msra.mxu1 %v835_v30  ;;  %v267_v7 = vld [vmem:[%s1917_s1 + $0x7d0] sm:$0xff]  ;;  %v144_v9 = vld [vmem:[%s1917_s1 + $0x3f8] sm:$0xff]  ;;  %v270_v10 = vld [vmem:[%s1917_s1 + $0x7e8] sm:$0xff]  ;;  %v851_v13 = vpack.c.bf16 %v139_v4, %v137_v3 }
  0x6e   :  { %964 = vmatpush1.bf16.msra.mxu0 %v963_v31  ;;  %838 = vmatprep.subr.bf16.mxu1 %v837_v33  ;;  %v272_v12 = vld [vmem:[%s1917_s1 + $0x7f8] sm:$0xff]  ;;  %v979_v14 = vpack.c.bf16 %v267_v7, %v265_v5  ;;  %v853_v15 = vpack.c.bf16 %v144_v9, %v142_v8  ;;  %v141_v16 = vld [vmem:[%s1917_s1 + $0x3e0] sm:$0xff]  ;;  %v143_v17 = vld [vmem:[%s1917_s1 + $0x3f0] sm:$0xff] }
  0x6f   :  { %966 = vmatprep.subr.bf16.mxu0 %v965_v37  ;;  %v981_v18 = vpack.c.bf16 %v272_v12, %v270_v10  ;;  %v269_v19 = vld [vmem:[%s1917_s1 + $0x7e0] sm:$0xff]  ;;  %v271_v20 = vld [vmem:[%s1917_s1 + $0x7f0] sm:$0xff]  ;;  %v855_v21 = vpack.c.bf16 %v143_v17, %v141_v16  ;;  %s1047_s1 = smov 118  }
  0x70   :  { %v983_v22 = vpack.c.bf16 %v271_v20, %v269_v19 }
  0x71   :  { %840 = vmatpush1.bf16.msra.mxu1 %v839_v42 }
  0x72   :  { %968 = vmatpush1.bf16.msra.mxu0 %v967_v43  ;;  %842 = vmatprep.subr.bf16.mxu1 %v841_v44 }
  0x73   :  { %970 = vmatprep.subr.bf16.mxu0 %v969_v48 }
  0x75   :  { %844 = vmatpush1.bf16.msra.mxu1 %v843_v52 }
  0x76   :  { %972 = vmatpush1.bf16.msra.mxu0 %v971_v53  ;;  %846 = vmatprep.subr.bf16.mxu1 %v845_v54 }
  0x77   :  { %974 = vmatprep.subr.bf16.mxu0 %v973_v58 }
  0x79   :  { %848 = vmatpush1.bf16.msra.mxu1 %v847_v0 }
  0x7a   :  { %976 = vmatpush1.bf16.msra.mxu0 %v975_v1  ;;  %850 = vmatprep.subr.bf16.mxu1 %v849_v2 }
  0x7b   :  { %978 = vmatprep.subr.bf16.mxu0 %v977_v6 }
  0x7d   :  { %852 = vmatpush1.bf16.msra.mxu1 %v851_v13 }
  0x7e   :  { %980 = vmatpush1.bf16.msra.mxu0 %v979_v14  ;;  %854 = vmatprep.subr.bf16.mxu1 %v853_v15  ;;  %v728_v14 = vld [vmem:[%s1918_s2] ss:$0 sm:$0xff] }
  0x7f   :  { %982 = vmatprep.subr.bf16.mxu0 %v981_v18 }
  0x81   :  { %856 = vmatpush1.bf16.msra.mxu1 %v855_v21 }
  0x82   :  { %984 = vmatpush1.bf16.msra.mxu0 %v983_v22 }
  0x84   :  { %453 = vmatmul.mubr.f32.vlgmr.msra.gmra.mrb[0].mxu1 %v1534_v29 }
  0x85   :  { %595 = vmatmul.mubr.f32.vlgmr.msra.gmra.mrb[0].mxu0 %v1543_v32 }
 0x157   :  { %v454_v23 = vpop.f32.mrb[0].mxu1 }
 0x158   :  { %v596_v24 = vpop.f32.mrb[0].mxu0  ;;  %v456_v26 = vpop.f32.mrb[1].mxu1 }
 0x159   :  { %v985_v27 = vadd.f32 %v596_v24, %v454_v23  ;;  %v598_v30 = vpop.f32.mrb[1].mxu0 }
 0x15a   :  { %v986_v31 = vadd.f32 %v598_v30, %v456_v26 }
 0x15b   :  { %610 = vrot.lane.b32.xlu1 %v985_v27, %s1046_s0  ;;  %602 = vrot.lane.b32.xlu0 %v985_v27, %s1047_s1 }
 0x15f   :  { %614 = vrot.lane.b32.xlu1 %v985_v27, %s1048_s4  ;;  %606 = vrot.lane.b32.xlu0 %v985_v27, %s1049_s5 }
 0x163   :  { %622 = vrot.lane.b32.xlu1 %v985_v27, %s1050_s6  ;;  %618 = vrot.lane.b32.xlu0 %v985_v27, %s1051_s7 }
 0x167   :  { %630 = vrot.lane.b32.xlu1 %v985_v27, %s1052_s8  ;;  %626 = vrot.lane.b32.xlu0 %v985_v27, %s1053_s9 }
 0x16b   :  { %638 = vrot.lane.b32.xlu1 %v985_v27, %s1054_s10  ;;  %634 = vrot.lane.b32.xlu0 %v985_v27, %s1055_s11 }
 0x16f   :  { %647 = vrot.lane.b32.xlu1 %v985_v27, %s1056_s12  ;;  %642 = vrot.lane.b32.xlu0 %v985_v27, %s1057_s13 }
 0x173   :  { %655 = vrot.lane.b32.xlu1 %v986_v31, %s1058_s14  ;;  %649 = vrot.lane.b32.xlu0 %v986_v31, %s1056_s12 }
 0x177   :  { %663 = vrot.lane.b32.xlu1 %v986_v31, %s1059_s15  ;;  %659 = vrot.lane.b32.xlu0 %v986_v31, %s1060_s16 }
 0x17b   :  { %671 = vrot.lane.b32.xlu1 %v986_v31, %s1061_s17  ;;  %667 = vrot.lane.b32.xlu0 %v986_v31, %s1062_s18 }
 0x17f   :  { %679 = vrot.lane.b32.xlu1 %v986_v31, %s1063_s19  ;;  %675 = vrot.lane.b32.xlu0 %v986_v31, %s1064_s20 }
 0x183   :  { %687 = vrot.lane.b32.xlu1 %v986_v31, %s1065_s21  ;;  %683 = vrot.lane.b32.xlu0 %v986_v31, %s1066_s22 }
 0x187   :  { %695 = vrot.lane.b32.xlu1 %v986_v31, %s1067_s23  ;;  %691 = vrot.lane.b32.xlu0 %v986_v31, %s1068_s24 }
 0x18b   :  { %699 = vrot.lane.b32.xlu0 %v986_v31, %s1069_s25 }
 0x1cd   :  { %v611_v29 = vpop.permute.xlu1 %610  ;;  %v603_v32 = vpop.permute.xlu0 %602 }
 0x1ce   :  { %v605_v33 = vmax.f32 %v985_v27, %v603_v32 }
 0x1d1   :  { %v615_v34 = vpop.permute.xlu1 %614  ;;  %v607_v35 = vpop.permute.xlu0 %606 }
 0x1d2   :  { %v609_v36 = vmax.f32 %v605_v33, %v607_v35 }
 0x1d4   :  { %v613_v37 = vmax.f32 %v609_v36, %v611_v29 }
 0x1d5   :  { %v623_v38 = vpop.permute.xlu1 %622  ;;  %v619_v11 = vpop.permute.xlu0 %618 }
 0x1d6   :  { %v617_v39 = vmax.f32 %v613_v37, %v615_v34 }
 0x1d8   :  { %v621_v40 = vmax.f32 %v617_v39, %v619_v11 }
 0x1d9   :  { %v631_v41 = vpop.permute.xlu1 %630  ;;  %v627_v42 = vpop.permute.xlu0 %626 }
 0x1da   :  { %v625_v43 = vmax.f32 %v621_v40, %v623_v38 }
 0x1dc   :  { %v629_v44 = vmax.f32 %v625_v43, %v627_v42 }
 0x1dd   :  { %v639_v45 = vpop.permute.xlu1 %638  ;;  %v635_v46 = vpop.permute.xlu0 %634 }
 0x1de   :  { %v633_v47 = vmax.f32 %v629_v44, %v631_v41 }
 0x1e0   :  { %v637_v48 = vmax.f32 %v633_v47, %v635_v46 }
 0x1e1   :  { %v648_v25 = vpop.permute.xlu1 %647  ;;  %v643_v49 = vpop.permute.xlu0 %642 }
 0x1e2   :  { %v641_v50 = vmax.f32 %v637_v48, %v639_v45 }
 0x1e4   :  { %v645_v51 = vmax.f32 %v641_v50, %v643_v49 }
 0x1e5   :  { %v656_v28 = vpop.permute.xlu1 %655  ;;  %v650_v52 = vpop.permute.xlu0 %649 }
 0x1e6   :  { %v652_v53 = vsel %vm651_vm0, %v648_v25, %v650_v52 }
 0x1e7   :  { %v654_v54 = vmax.f32 %v645_v51, %v652_v53 }
 0x1e9   :  { %v664_v55 = vpop.permute.xlu1 %663  ;;  %v658_v56 = vmax.f32 %v654_v54, %v656_v28  ;;  %v660_v57 = vpop.permute.xlu0 %659 }
 0x1eb   :  { %v662_v58 = vmax.f32 %v658_v56, %v660_v57 }
 0x1ed   :  { %v672_v59 = vpop.permute.xlu1 %671  ;;  %v666_v60 = vmax.f32 %v662_v58, %v664_v55  ;;  %v668_v61 = vpop.permute.xlu0 %667 }
 0x1ef   :  { %v670_v62 = vmax.f32 %v666_v60, %v668_v61 }
 0x1f1   :  { %v680_v63 = vpop.permute.xlu1 %679  ;;  %v674_v0 = vmax.f32 %v670_v62, %v672_v59  ;;  %v676_v1 = vpop.permute.xlu0 %675 }
 0x1f3   :  { %v678_v2 = vmax.f32 %v674_v0, %v676_v1 }
 0x1f5   :  { %v682_v3 = vmax.f32 %v678_v2, %v680_v63  ;;  %v684_v4 = vpop.permute.xlu0 %683  ;;  %v688_v5 = vpop.permute.xlu1 %687 }
 0x1f7   :  { %v686_v6 = vmax.f32 %v682_v3, %v684_v4 }
 0x1f9   :  { %v690_v7 = vmax.f32 %v686_v6, %v688_v5  ;;  %v692_v8 = vpop.permute.xlu0 %691  ;;  %v696_v10 = vpop.permute.xlu1 %695 }
 0x1fb   :  { %v694_v9 = vmax.f32 %v690_v7, %v692_v8 }
 0x1fd   :  { %v698_v12 = vmax.f32 %v694_v9, %v696_v10  ;;  %v700_v13 = vpop.permute.xlu0 %699 }
 0x1ff   :  { %v702_v15 = vmax.f32 %v698_v12, %v700_v13 }
 0x201   :  { %v710_v16 = vadd.f32 %v728_v14, %v702_v15 }
 0x203   :  { %1019 = vtanh.f32 %v710_v16 }
 0x20d   :  { %v1020_v17 = vpop.eup %1019 }
 0x20e   :  { %713 = vst.msk [vmem:[#allocation2] sm:$0x3] %vm712_vm1, %v1020_v17 }
 0x20f   :  { %1032 = shalt.err (!%p1029_p4)
}
 0x210   :  { %s1033_s2 = scalar_lea.hbm %s1919_s3, 32 }
 0x211   :  { %p1034_p5 = scmp.ne.s32.totalorder %s1919_s3, %s1033_s2  ;;  %p1037_p6 = scmp.lt.u32.totalorder %s1033_s2, %s1919_s3 }
 0x213   :  { %p1039_p7 = pnand %p1037_p6, %p1034_p5 }
 0x215   :  { %1042 = shalt.err (!%p1039_p7)
}
 0x216   :  { %723 = dma.vmem_to_hbm [thread:$0]  %s721_s29, 32, %s1919_s3, [#allocation3]  }
 0x217   :  { %1043 = dma.done.wait [#allocation3], 32  }
 0x218   :  { %1044 = vsyncadd [#allocation3], 4294967264 }
 0x219   :  { %727 = vsyncpa [#allocation3], 1 }

</bundles_post_ra>
